<compile_context>
chip_gen: v7x
topology: tpu7x:2x2x1
jax: 0.10.0
libtpu: 0.0.40
codegen_flags: <defaults>
</compile_context>

<pallas_src>
import functools

import jax
import jax.numpy as jnp
from jax import lax
from jax.experimental import pallas as pl
from jax.experimental.pallas import tpu as pltpu

_LANES = 128
_DEFAULT_ROW_TILE = 2048   # (2048, 128) f32 block = 1 MiB; 2 in x 2 buf = 4 MiB VMEM
_NUM_CORES = 2             # per-core partial accumulators (v7x megacore; harmless on 1-TC chips)


def _bce_kernel(p_ref, gt_ref, acc_ref, *, n_valid, row_tile, blocks_per_core):
    c = pl.program_id(0)   # "core" / parallel axis
    j = pl.program_id(1)   # reduction axis (arbitrary)

    @pl.when(j == 0)
    def _():
        acc_ref[...] = jnp.zeros_like(acc_ref)

    p = p_ref[...].astype(jnp.float32)
    gt = gt_ref[...].astype(jnp.float32)

    # Linear element index of every slot in this (raw, unclamped) block.
    # Blocks past the end of the array (clamped DMA) and the padded tail of
    # the last real block end up with lin >= n_valid and contribute 0.
    block = c * blocks_per_core + j
    base = block * (row_tile * _LANES)
    row = lax.broadcasted_iota(jnp.int32, (row_tile, _LANES), 0)
    lane = lax.broadcasted_iota(jnp.int32, (row_tile, _LANES), 1)
    lin = base + row * _LANES + lane
    valid = lin < n_valid

    # y = (gt > 0);  BCE term = -max(log(y ? p : 1-p), -100)   (PyTorch clamp).
    sel = jnp.where(gt > 0.0, p, 1.0 - p)
    sel = jnp.where(valid, sel, 1.0)            # log(1) = 0 for padding / OOB data
    per_elem = -jnp.maximum(jnp.log(sel), -100.0)

    # Pure VPU accumulate into the VMEM-resident per-core output block.
    acc_ref[...] += per_elem[None]


def _to_slab(x):
    """Flatten to a lane-dense (rows, 128) slab in native dtype.

    Pads only the sub-128 tail (if any); validity is handled in-kernel, so the
    pad value is irrelevant.
    """
    flat = x.reshape(-1)
    n = flat.shape[0]
    rem = n % _LANES
    if rem:
        flat = jnp.pad(flat, (0, _LANES - rem))
    return flat.reshape(-1, _LANES), n


def bce_loss_pallas(preds, gt_singles, *, row_tile=_DEFAULT_ROW_TILE):
    """Mean BCE loss:  mean(-(y*log(p) + (1-y)*log(1-p))),  y = (gt > 0)."""
    p2d, n = _to_slab(preds)
    g2d, n_g = _to_slab(gt_singles)
    assert n == n_g, "preds / GT_singles size mismatch"

    rows = p2d.shape[0]
    row_tile = min(row_tile, rows)          # small inputs: block == full array dim
    num_blocks = pl.cdiv(rows, row_tile)
    blocks_per_core = pl.cdiv(num_blocks, _NUM_CORES)
    grid = (_NUM_CORES, blocks_per_core)

    def in_index_map(c, j):
        # Clamp so the DMA never walks off the array; the kernel masks the
        # contribution of any clamped (duplicate) block via the raw block id.
        return (jnp.minimum(c * blocks_per_core + j, num_blocks - 1), 0)

    in_spec = pl.BlockSpec((row_tile, _LANES), in_index_map)
    out_spec = pl.BlockSpec((1, row_tile, _LANES), lambda c, j: (c, 0, 0))

    kernel = functools.partial(
        _bce_kernel,
        n_valid=n,
        row_tile=row_tile,
        blocks_per_core=blocks_per_core,
    )

    partials = pl.pallas_call(
        kernel,
        out_shape=jax.ShapeDtypeStruct((_NUM_CORES, row_tile, _LANES), jnp.float32),
        grid_spec=pltpu.PrefetchScalarGridSpec(
            num_scalar_prefetch=0,
            grid=grid,
            in_specs=[in_spec, in_spec],
            out_specs=out_spec,
        ),
        compiler_params=pltpu.CompilerParams(
            dimension_semantics=("parallel", "arbitrary"),
        ),
    )(p2d, g2d)

    # Tiny final reduction of the per-core partial blocks (<= 2 MiB).
    return jnp.sum(partials) / jnp.float32(n)


def loss_g_forward(outputs, inputs):
    """JAX/Pallas equivalent of LossG.forward."""
    preds = outputs["preds"]
    gt = inputs["GT_singles"]
    loss_bce = bce_loss_pallas(preds, gt)
    losses = {"loss_BCE": loss_bce, "loss": loss_bce}
    return losses


def _reference_bce(preds, gt):
    y = (gt > 0).astype(jnp.float32)
    p = preds.astype(jnp.float32)
    log_p = jnp.maximum(jnp.log(p), -100.0)
    log_1mp = jnp.maximum(jnp.log(1.0 - p), -100.0)
    return jnp.mean(-(y * log_p + (1.0 - y) * log_1mp))


if __name__ == "__main__":
    key = jax.random.PRNGKey(0)
    k1, k2 = jax.random.split(key)

    # Small NCHW shapes: batch=2, channels=4, spatial=16x16.
    B, C, H, W = 2, 4, 16, 16
    # preds must be probabilities in (0, 1) for BCELoss.
    preds = jax.nn.sigmoid(jax.random.normal(k1, (B, C, H, W), jnp.float32))
    gt_singles = jax.random.normal(k2, (B, C, H, W), jnp.float32)

    outputs = {"preds": preds}
    inputs = {"GT_singles": gt_singles}

    losses = loss_g_forward(outputs, inputs)
    loss_val = jax.block_until_ready(losses["loss"])

    ref = _reference_bce(preds, gt_singles)
    assert jnp.allclose(loss_val, ref, rtol=1e-5, atol=1e-5), (loss_val, ref)

    print("KERNEL_OK")
</pallas_src>

<mosaic_0001>
module attributes {stable_mosaic.version = 11 : i64} {
  func.func @_bce_kernel(%arg0: i32, %arg1: i32, %arg2: memref<16x128xf32, #tpu.memory_space<vmem>>, %arg3: memref<16x128xf32, #tpu.memory_space<vmem>>, %arg4: memref<1x16x128xf32, #tpu.memory_space<vmem>>) attributes {dimension_semantics = [#tpu.dimension_semantics<parallel>, #tpu.dimension_semantics<arbitrary>], iteration_bounds = array<i64: 2, 1>, scalar_prefetch = 0 : i64, scratch_operands = 0 : i64, tpu.core_type = #tpu.core_type<tc>, window_params = [{transform_indices = @transform_0, window_bounds = array<i64: 16, 128>}, {transform_indices = @transform_1, window_bounds = array<i64: 16, 128>}, {transform_indices = @transform_2, window_bounds = array<i64: 1, 16, 128>}]} {
    %c0_i32 = arith.constant 0 : i32
    %0 = arith.cmpi eq, %arg1, %c0_i32 : i32
    %1 = arith.extui %0 : i1 to i32
    %c0_i32_0 = arith.constant 0 : i32
    %2 = arith.cmpi ne, %1, %c0_i32_0 : i32
    scf.if %2 {
      %cst_15 = arith.constant 0.000000e+00 : f32
      %33 = vector.broadcast %cst_15 : f32 to vector<1x16x128xf32>
      %c0_16 = arith.constant 0 : index
      %c0_17 = arith.constant 0 : index
      %c0_18 = arith.constant 0 : index
      %34 = vector.load %arg4[%c0_16, %c0_17, %c0_18] : memref<1x16x128xf32, #tpu.memory_space<vmem>>, vector<1x16x128xf32>
      tpu.vector_store %arg4[%c0_16, %c0_17, %c0_18], %33 {strides = array<i32>} : memref<1x16x128xf32, #tpu.memory_space<vmem>>, vector<1x16x128xf32>,
    } else {
    }
    %c0 = arith.constant 0 : index
    %c0_1 = arith.constant 0 : index
    %3 = vector.load %arg2[%c0, %c0_1] : memref<16x128xf32, #tpu.memory_space<vmem>>, vector<16x128xf32>
    %c0_2 = arith.constant 0 : index
    %c0_3 = arith.constant 0 : index
    %4 = vector.load %arg3[%c0_2, %c0_3] : memref<16x128xf32, #tpu.memory_space<vmem>>, vector<16x128xf32>
    %c1_i32 = arith.constant 1 : i32
    %5 = arith.muli %arg0, %c1_i32 : i32
    %6 = arith.addi %5, %arg1 : i32
    %c2048_i32 = arith.constant 2048 : i32
    %7 = arith.muli %6, %c2048_i32 : i32
    %8 = tpu.iota {dimensions = array<i32: 0>} : vector<16x128xi32>
    %9 = tpu.iota {dimensions = array<i32: 1>} : vector<16x128xi32>
    %c128_i32 = arith.constant 128 : i32
    %10 = vector.broadcast %c128_i32 : i32 to vector<16x128xi32>
    %11 = arith.muli %8, %10 : vector<16x128xi32>
    %12 = vector.broadcast %7 : i32 to vector<16x128xi32>
    %13 = arith.addi %12, %11 : vector<16x128xi32>
    %14 = arith.addi %13, %9 : vector<16x128xi32>
    %c2048_i32_4 = arith.constant 2048 : i32
    %15 = vector.broadcast %c2048_i32_4 : i32 to vector<16x128xi32>
    %16 = arith.cmpi slt, %14, %15 : vector<16x128xi32>
    %cst = arith.constant 0.000000e+00 : f32
    %17 = vector.broadcast %cst : f32 to vector<16x128xf32>
    %18 = arith.cmpf ogt, %4, %17 : vector<16x128xf32>
    %cst_5 = arith.constant 1.000000e+00 : f32
    %19 = vector.broadcast %cst_5 : f32 to vector<16x128xf32>
    %20 = arith.subf %19, %3 : vector<16x128xf32>
    %21 = arith.select %18, %3, %20 : vector<16x128xi1>, vector<16x128xf32>
    %cst_6 = arith.constant 1.000000e+00 : f32
    %22 = vector.broadcast %cst_6 : f32 to vector<16x128xf32>
    %23 = arith.select %16, %21, %22 : vector<16x128xi1>, vector<16x128xf32>
    %24 = math.log %23 : vector<16x128xf32>
    %cst_7 = arith.constant -1.000000e+02 : f32
    %25 = vector.broadcast %cst_7 : f32 to vector<16x128xf32>
    %26 = arith.maximumf %24, %25 : vector<16x128xf32>
    %cst_8 = arith.constant 0.000000e+00 : f32
    %27 = vector.broadcast %cst_8 : f32 to vector<16x128xf32>
    %28 = arith.subf %27, %26 : vector<16x128xf32>
    %c0_9 = arith.constant 0 : index
    %c0_10 = arith.constant 0 : index
    %c0_11 = arith.constant 0 : index
    %29 = vector.load %arg4[%c0_9, %c0_10, %c0_11] : memref<1x16x128xf32, #tpu.memory_space<vmem>>, vector<1x16x128xf32>
    %30 = vector.shape_cast %28 : vector<16x128xf32> to vector<1x16x128xf32>
    %31 = arith.addf %29, %30 : vector<1x16x128xf32>
    %c0_12 = arith.constant 0 : index
    %c0_13 = arith.constant 0 : index
    %c0_14 = arith.constant 0 : index
    %32 = vector.load %arg4[%c0_12, %c0_13, %c0_14] : memref<1x16x128xf32, #tpu.memory_space<vmem>>, vector<1x16x128xf32>
    tpu.vector_store %arg4[%c0_12, %c0_13, %c0_14], %31 {strides = array<i32>} : memref<1x16x128xf32, #tpu.memory_space<vmem>>, vector<1x16x128xf32>,
    return
  }
  func.func @transform_0(%arg0: i32, %arg1: i32) -> (i32, i32) {
    %c1_i32 = arith.constant 1 : i32
    %0 = arith.muli %arg0, %c1_i32 : i32
    %1 = arith.addi %0, %arg1 : i32
    %c0_i32 = arith.constant 0 : i32
    %2 = arith.minsi %1, %c0_i32 : i32
    %c0_i32_0 = arith.constant 0 : i32
    %c0_i32_1 = arith.constant 0 : i32
    return %2, %c0_i32_0 : i32, i32
  }
  func.func @transform_1(%arg0: i32, %arg1: i32) -> (i32, i32) {
    %c1_i32 = arith.constant 1 : i32
    %0 = arith.muli %arg0, %c1_i32 : i32
    %1 = arith.addi %0, %arg1 : i32
    %c0_i32 = arith.constant 0 : i32
    %2 = arith.minsi %1, %c0_i32 : i32
    %c0_i32_0 = arith.constant 0 : i32
    %c0_i32_1 = arith.constant 0 : i32
    return %2, %c0_i32_0 : i32, i32
  }
  func.func @transform_2(%arg0: i32, %arg1: i32) -> (i32, i32, i32) {
    %c0_i32 = arith.constant 0 : i32
    %c0_i32_0 = arith.constant 0 : i32
    %c0_i32_1 = arith.constant 0 : i32
    return %arg0, %c0_i32, %c0_i32_0 : i32, i32, i32
  }
}

</mosaic_0001>

<bundles_post_ra>
// kernel: tpu_custom_call.1
= control target key start
LH: loop header
LB: loop body
LE: loop exit
PB: predicated region body
PF: predicated region fallthrough
CT: control target
= control target key end

     0   :  { %7 = vsyncpa [#allocation3], 0  ;;  %s927_s0 = inlined_call_operand.hbm [shape: f32[16,128], index: 0, kind: input, shape index: {}]   ;;  %s928_s1 = inlined_call_operand.hbm [shape: f32[16,128], index: 1, kind: input, shape index: {}]   ;;  %s929_s2 = inlined_call_operand.hbm [shape: f32[2,16,128], index: 2, kind: output, shape index: {}]  }
   0x1   :  { %9 = vsyncpa [#allocation3 + $0x1], 0 }
   0x2   :  { %10 = vsyncpa [#allocation6], 0 }
   0x3   :  { %12 = vsyncpa [#allocation6 + $0x1], 0 }
   0x4   :  { %13 = vsyncpa [#allocation4], 0 }
   0x5   :  { %15 = vsyncpa [#allocation4 + $0x1], 0  ;;  %s720_s9 = smov 0   ;;  %s722_s10 = smov 0  }
   0x6   :  { %s724_s11 = smov 0   ;;  %s726_s12 = smov 0  }
   0x7   :  { %s728_s13 = smov 0   ;;  %s730_s14 = smov 0  }
   0x8   :  { %s732_s15 = smov 0   ;;  %s734_s16 = smov 0  }
   0x9 LB: > { %s406_s17 = sadd.s32 4294967295, %s696_s16   ;;  %s407_s18 = sadd.s32 4294967294, %s696_s16   ;;  %s696_s16 = sphi %s734_s16, %s21_s16   ;;  %s692_s15 = sphi %s732_s15, %s948_s15   ;;  %s688_s14 = sphi %s730_s14, %s947_s14   ;;  %s684_s13 = sphi %s728_s13, %s917_s13   ;;  %s680_s12 = sphi %s726_s12, %s946_s12   ;;  %s676_s11 = sphi %s724_s11, %s945_s11   ;;  %s672_s10 = sphi %s722_s10, %s944_s10   ;;  %s668_s9 = sphi %s720_s9, %s943_s9  }
   0xa   : > { %s33_s19 = sadd.s32 1, %s692_s15  ;;  %p665_p1 = scmp.ne.s32.totalorder %s684_s13, 0 }
   0xb   : > { %p35_p0 = scmp.ge.s32.totalorder %s33_s19, 2  ;;  %p54_p2 = scmp.eq.s32.totalorder %s696_s16, 0 }
   0xc   : > { %p59_p3 = scmp.ne.s32.totalorder %s684_s13, %s680_s12  ;;  %p60_p5 = scmp.eq.s32.totalorder %s406_s17, 0 }
   0xd   : > { %s950_s19 = smov (%p35_p0, %s33_s19), 0  ;;  %p766_p4 = por %p665_p1, %p54_p2 }
   0xe   : > { %p770_p6 = por %p60_p5, %p59_p3  ;;  %s101_s22 = ssub.s32 %s692_s15, %s950_s19 }
   0xf   : > { %p102_p7 = scmp.eq.s32.totalorder %s101_s22, 0  ;;  %s104_s23 = sadd.s32 1, %s676_s11 }
  0x10   : > { %s933_s21 = scalar_select %p770_p6, 1, 0 }
  0x11   : > { %s778_s24 = scalar_select %p102_p7, %s676_s11, %s104_s23  }
  0x12   : > { %p114_p8 = scmp.ne.s32.totalorder %s676_s11, %s672_s10  ;;  %p115_p9 = scmp.eq.s32.totalorder %s406_s17, 1 }
  0x13   : > { %p120_p10 = scmp.ne.s32.totalorder %s672_s10, %s668_s9  ;;  %p121_p11 = scmp.eq.s32.totalorder %s407_s18, 1 }
  0x14   : > { %p784_p12 = por %p115_p9, %p114_p8  ;;  %p446_p1 = scmp.lt.s32.totalorder %s696_s16, 2 }
  0x15   : > { %p789_p0 = por %p121_p11, %p120_p10  ;;  %s698_s27 = smov [#allocation2]  }
  0x16   : > { %s934_s25 = scalar_select %p784_p12, 1, 0 }
  0x17   : > { %s935_s26 = scalar_select %p789_p0, 1, 0 }
  0x18   : > { %s155_s28 = sshll.u32 %s698_s27, 4  ;;  %p796_p2 = pnand %p446_p1, %p766_p4  ;;  %s156_s28 = int_to_ptr.vmem [resolvable:$true] %s155_s28 }
  0x19   : > { %s529_s4 = scalar_lea.hbm %s927_s0, 256 }
  0x1a   : > { %p530_p3 = scmp.ne.s32.totalorder %s927_s0, %s529_s4  ;;  %p531_p5 = pneg %p796_p2 }
  0x1b   : > { %p536_p8 = scmp.lt.u32.totalorder %s529_s4, %s529_s4  ;;  %p538_p9 = scmp.lt.u32.totalorder %s529_s4, %s927_s0 }
  0x1c   : > { %p532_p7 = pnand %p531_p5, %p530_p3 }
  0x1d   : > { %p539_p10 = por %p538_p9, %p536_p8 }
  0x1e   : > { %p533_p4 = pneg %p532_p7 }
  0x20   : > { %p540_p11 = pnand %p539_p10, %p533_p4 }
  0x22   : > { %543 = shalt.err (!%p540_p11)
}
  0x23   : > { %s544_s12 = scalar_lea.vmem %s156_s28, 256  ;;  %s551_s17 = scalar_lea.vmem %s156_s28, 512 }
  0x24   : > { %p545_p1 = scmp.ne.s32.totalorder %s156_s28, %s544_s12  ;;  %p552_p12 = scmp.lt.s32.totalorder %s156_s28, %s156_s28 }
  0x25   : > { %p553_p6 = scmp.lt.s32.totalorder %s551_s17, %s544_s12 }
  0x26   : > { %p547_p13 = pnand %p545_p1, %p531_p5 }
  0x27   : > { %p554_p3 = por %p553_p6, %p552_p12 }
  0x28   : > { %p548_p0 = pneg %p547_p13 }
  0x2a   : > { %p555_p7 = pnand %p554_p3, %p548_p0 }
  0x2c   : > { %558 = shalt.err (!%p555_p7)
}
  0x2d   : > { %s699_s18 = smov 128   ;;  %s700_s20 = smov 8  }
  0x2e   : > { %438 = dma.hbm_to_vmem [thread:$0]  (!%p796_p2), %s927_s0, 256, %s156_s28, [#allocation3], %s699_s18, %s699_s18, %s700_s20  }
  0x2f   : > { %p416_p13 = scmp.ge.s32.totalorder %s696_s16, 1  ;;  %p187_p4 = scmp.lt.s32.totalorder %s696_s16, 3 }
  0x30   : > { %s701_s30 = smov [#allocation5]   ;;  %s559_s6 = scalar_lea.hbm %s928_s1, 256 }
  0x31   : > { %p827_p8 = pnand %p416_p13, %p187_p4  ;;  %s179_s3 = sshll.u32 %s701_s30, 4  ;;  %s180_s3 = int_to_ptr.vmem [resolvable:$true] %s179_s3 }
  0x32   : > { %p560_p6 = scmp.ne.s32.totalorder %s928_s1, %s559_s6  ;;  %p566_p9 = scmp.lt.u32.totalorder %s559_s6, %s559_s6 }
  0x33   : > { %s937_s27 = scalar_select %p827_p8, 1, 0 }
  0x34   : > { %p562_p12 = pnand %p560_p6, %p531_p5  ;;  %p568_p10 = scmp.lt.u32.totalorder %s559_s6, %s928_s1 }
  0x36   : > { %p563_p0 = pneg %p562_p12  ;;  %p569_p11 = por %p568_p10, %p566_p9 }
  0x38   : > { %p570_p1 = pnand %p569_p11, %p563_p0 }
  0x3a   : > { %573 = shalt.err (!%p570_p1)
}
  0x3b   : > { %s574_s17 = scalar_lea.vmem %s180_s3, 256  ;;  %s581_s22 = scalar_lea.vmem %s180_s3, 512 }
  0x3c   : > { %p575_p3 = scmp.ne.s32.totalorder %s180_s3, %s574_s17  ;;  %p582_p4 = scmp.lt.s32.totalorder %s180_s3, %s180_s3 }
  0x3d   : > { %p583_p8 = scmp.lt.s32.totalorder %s581_s22, %s574_s17 }
  0x3e   : > { %p577_p7 = pnand %p575_p3, %p531_p5 }
  0x3f   : > { %p584_p6 = por %p583_p8, %p582_p4 }
  0x40   : > { %p578_p13 = pneg %p577_p7 }
  0x42   : > { %p585_p12 = pnand %p584_p6, %p578_p13 }
  0x44   : > { %588 = shalt.err (!%p585_p12)
}
  0x45   : > { %441 = dma.hbm_to_vmem [thread:$0]  (!%p796_p2), %s928_s1, 256, %s180_s3, [#allocation6], %s699_s18, %s699_s18, %s700_s20  }
  0x46   : > { %p938_p0 = scmp.ne.s32.totalorder %s937_s27, 0 }
  0x47   : > { %s193_s4 = sand.u32 (!%p938_p0), 1, %s684_s13   ;;  %p939_p5 = scmp.ne.s32.totalorder (!%p938_p0), %s933_s21, 0 }
  0x48   : > { %191 = sbr.rel (%p938_p0) target bundleno = 128 (0x80), region = 28  ;;  %s417_s5 = sshll.u32 (!%p938_p0), %s193_s4, 4 }
  0x49   : > { %s194_s6 = scalar_lea.sflag (!%p938_p0), [#allocation3], %s193_s4  ;;  %s197_s7 = scalar_lea.vmem (!%p938_p0), [#allocation2], %s417_s5 }
  0x4f   : > { %654 = dma.done.wait (%p939_p5), %s194_s6, 256  }
  0x50   : > { %656 = vsyncadd (%p939_p5), %s194_s6, 4294967040  ;;  %s203_s29 = scalar_lea.sflag [#allocation6], %s193_s4  ;;  %s206_s8 = scalar_lea.vmem [#allocation5], %s417_s5 }
  0x51   : > { %658 = dma.done.wait (%p939_p5), %s203_s29, 256  }
  0x52   : > { %660 = vsyncadd (%p939_p5), %s203_s29, 4294967040  ;;  %s420_s18 = sshll.u32 %s688_s14, 11  ;;  %v252_v0 = vlaneseq  ;;  %v246_v8 = vld [vmem:[%s197_s7] sm:$0xff]  ;;  %v247_v10 = vld [vmem:[%s197_s7 + $0x8] sm:$0xff]  ;;  %s229_s21 = sand.u32 1, %s672_s10  }
  0x53   : > { %v259_v2 = vstv %s420_s18  ;;  %v248_v9 = vld [vmem:[%s206_s8] sm:$0xff]  ;;  %v268_v12 = vsub.f32 1.0, %v246_v8  ;;  %v249_v13 = vld [vmem:[%s206_s8 + $0x8] sm:$0xff]  ;;  %v269_v15 = vsub.f32 1.0, %v247_v10  ;;  %s419_s20 = sshll.u32 %s229_s21, 4  ;;  %s428_s27 = sshll.u32 %s688_s14, 8 }
  0x54   : > { %v253_v1 = vshrl.u32 %v252_v0, 7  ;;  %v256_v3 = vand.u32 127, %v252_v0  ;;  %vm266_vm0 = vcmp.gt.f32.partialorder %v248_v9, 0.0  ;;  %vm267_vm1 = vcmp.gt.f32.partialorder %v249_v13, 0.0  ;;  %s231_s3 = scalar_lea.vmem [#allocation7], %s419_s20  ;;  %s871_s22 = scalar_lea.hbm %s929_s2, %s428_s27 }
  0x55   : > { %v270_v16 = vsel %vm266_vm0, %v246_v8, %v268_v12  ;;  %v271_v19 = vsel %vm267_vm1, %v247_v10, %v269_v15  ;;  %s302_s28 = sshll.u32 %s231_s3, 4  ;;  %s875_s23 = scalar_lea.sflag [#allocation4], %s229_s21  ;;  %s873_s28 = int_to_ptr.vmem [resolvable:$true] %s302_s28 }
  0x56   : > { %v257_v4 = vmul.u32 128, %v253_v1  ;;  %v254_v5 = vadd.s32 8, %v253_v1  ;;  %s589_s30 = scalar_lea.vmem %s873_s28, 256  ;;  %p940_p8 = scmp.ne.s32.totalorder %s934_s25, 0 }
  0x57   : > { %p590_p2 = scmp.ne.s32.totalorder %s873_s28, %s589_s30  ;;  %s702_s14 = smov [#allocation7]  }
  0x58   : > { %v260_v6 = vadd.s32 %v259_v2, %v257_v4  ;;  %v258_v7 = vmul.u32 128, %v254_v5  ;;  %s593_s4 = sshll.u32 %s702_s14, 4  ;;  %s594_s4 = int_to_ptr.vmem [resolvable:$false] %s593_s4 }
  0x59   : > { %p591_p9 = pnand %p590_p2, %p940_p8  ;;  %s595_s5 = scalar_lea.vmem %s594_s4, 512 }
  0x5a   : > { %v262_v11 = vadd.s32 %v260_v6, %v256_v3  ;;  %v261_v14 = vadd.s32 %v259_v2, %v258_v7  ;;  %p596_p11 = scmp.lt.s32.totalorder %s873_s28, %s594_s4  ;;  %p597_p1 = scmp.lt.s32.totalorder %s595_s5, %s589_s30 }
  0x5b   : > { %p592_p10 = pneg %p591_p9 }
  0x5c   : > { %vm264_vm2 = vcmp.lt.s32.totalorder %v262_v11, 2048  ;;  %v263_v17 = vadd.s32 %v261_v14, %v256_v3  ;;  %p598_p3 = por %p597_p1, %p596_p11 }
  0x5d   : > { %v272_v18 = vsel %vm264_vm2, %v270_v16, 1.0 }
  0x5e   : > { %525 = vlog2.f32 %v272_v18  ;;  %vm265_vm3 = vcmp.lt.s32.totalorder %v263_v17, 2048  ;;  %p599_p7 = pnand %p598_p3, %p592_p10 }
  0x5f   : > { %v273_v20 = vsel %vm265_vm3, %v271_v19, 1.0 }
  0x60   : > { %527 = vlog2.f32 %v273_v20 }
  0x68   : > { %v526_v21 = vpop.eup %525 }
  0x69   : > { %v275_v22 = vmul.f32 0.6931472, %v526_v21 }
  0x6a   : > { %v528_v23 = vpop.eup %527 }
  0x6b   : > { %v278_v24 = vmax.f32 %v275_v22, -100.0  ;;  %v277_v25 = vmul.f32 0.6931472, %v528_v23 }
  0x6d   : > { %v280_v26 = vsub.f32 0.0, %v278_v24  ;;  %v279_v27 = vmax.f32 %v277_v25, -100.0 }
  0x6f   : > { %v281_v28 = vsub.f32 0.0, %v279_v27  ;;  %286 = vst [vmem:[%s231_s3] sm:$0xff] %v280_v26 }
  0x71   : > { %287 = vst [vmem:[%s231_s3 + $0x8] sm:$0xff] %v281_v28 }
  0x72   : > { %602 = shalt.err (!%p599_p7)
}
  0x73   : > { %s603_s6 = scalar_lea.hbm %s871_s22, 256  ;;  %s607_s8 = scalar_lea.hbm %s929_s2, 512 }
  0x74   : > { %p604_p13 = scmp.ne.s32.totalorder %s871_s22, %s603_s6  ;;  %p608_p12 = scmp.lt.u32.totalorder %s871_s22, %s929_s2 }
  0x75   : > { %p609_p0 = scmp.lt.u32.totalorder %s607_s8, %s603_s6  ;;  %p611_p2 = scmp.lt.u32.totalorder %s603_s6, %s871_s22 }
  0x76   : > { %p605_p4 = pnand %p604_p13, %p940_p8 }
  0x77   : > { %p610_p5 = por %p609_p0, %p608_p12 }
  0x78   : > { %p606_p6 = pneg %p605_p4 }
  0x79   : > { %p612_p9 = por %p611_p2, %p610_p5 }
  0x7b   : > { %p613_p10 = pnand %p612_p9, %p606_p6 }
  0x7d   : > { %616 = shalt.err (!%p613_p10)
}
  0x7e   : > { %s703_s20 = smov 128   ;;  %s704_s27 = smov 8  }
  0x7f   : > { %433 = dma.vmem_to_hbm [thread:$0]  (%p940_p8), %s873_s28, 256, %s871_s22, %s875_s23, %s703_s20, %s703_s20, %s704_s27  }
  0x80 PF: > { %s317_s3 = sand.u32 1, %s668_s9   ;;  %p941_p11 = scmp.ne.s32.totalorder %s935_s26, 0 }
  0x81   : > { %p942_p1 = scmp.ge.s32.totalorder %s696_s16, 2  ;;  %s318_s12 = scalar_lea.sflag [#allocation4], %s317_s3 }
  0x83   : > { %p443_p3 = pnand %p942_p1, %p941_p11 }
  0x85   : > { %662 = dma.done.wait (!%p443_p3), %s318_s12, 256  }
  0x86   : > { %664 = vsyncadd (!%p443_p3), %s318_s12, 4294967040  ;;  %s21_s16 = sadd.s32 1, %s696_s16   ;;  %s943_s9 = smov %s672_s10 }
  0x87   : > { %p18_p7 = scmp.ge.s32.totalorder %s21_s16, 4   ;;  %s944_s10 = smov %s676_s11 }
  0x88   : > { %s945_s11 = smov %s778_s24  ;;  %s946_s12 = smov %s684_s13 }
  0x89   : > { %s917_s13 = smov 0   ;;  %s947_s14 = smov %s692_s15 }
  0x8a   : > { %s948_s15 = smov %s950_s19  ;;  %20 = sbr.rel (!%p18_p7) target bundleno = 9 (0x9), region = 90 }
  0x91   :  { %323 = vsyncpa [#allocation3], 1 }
  0x92   :  { %325 = vsyncpa [#allocation3 + $0x1], 1 }
  0x93   :  { %326 = vsyncpa [#allocation6], 1 }
  0x94   :  { %328 = vsyncpa [#allocation6 + $0x1], 1 }
  0x95   :  { %329 = vsyncpa [#allocation4], 1 }
  0x96   :  { %331 = vsyncpa [#allocation4 + $0x1], 1 }

</bundles_post_ra>
